<compile_context>
chip_gen: v6e
topology: v6e:2x2x1
jax: 0.10.0
libtpu: 0.0.40
codegen_flags: <defaults>
</compile_context>

<pallas_src>
import functools

import jax
import jax.numpy as jnp
import numpy as np
from jax.experimental import pallas as pl
from jax.experimental.pallas import tpu as pltpu

LANES = 128
SUBLANES = 8
TILE_ROWS = 512                       # rows per grid step (multiple of 8 and 16)
TILE_ELEMS = TILE_ROWS * LANES        # 65536 elements per tile


def _fused_sqdiff_kernel(fid_ref, out_ref, tgt_ref, acc_ref):
    """Accumulate sum((out - tgt)^2) of the current tile into its feature's block.

    fid_ref : (num_tiles,) int32 in SMEM (scalar prefetch): tile -> feature id
    out_ref : (TILE_ROWS, 128) tile of the fused output-feature slab
    tgt_ref : (TILE_ROWS, 128) tile of the fused target-feature slab
    acc_ref : (1, 8, 128) f32 resident accumulator block of this tile's feature
    """
    i = pl.program_id(0)
    fid = fid_ref[i]
    prev_fid = fid_ref[jnp.maximum(i - 1, 0)]

    # Fresh output block: first tile overall, or first tile of a new feature
    # (feature tiles are contiguous and in increasing id order).
    @pl.when((i == 0) | (fid != prev_fid))
    def _():
        acc_ref[...] = jnp.zeros_like(acc_ref)

    d = out_ref[...].astype(jnp.float32) - tgt_ref[...].astype(jnp.float32)
    sq = d * d
    # Vreg-shaped partial reduction: (512,128) -> (8,128) with pure VPU adds
    # over sublane groups; no cross-lane/sublane XLU work in the hot loop.
    partial = jnp.sum(sq.reshape(TILE_ROWS // SUBLANES, SUBLANES, LANES), axis=0)
    acc_ref[...] += partial[None]


def _fused_feature_ssd(fids, out_slab, tgt_slab, num_features):
    """Per-feature sum of squared differences from the fused slabs."""
    num_tiles = out_slab.shape[0] // TILE_ROWS
    acc = pl.pallas_call(
        _fused_sqdiff_kernel,
        out_shape=jax.ShapeDtypeStruct((num_features, SUBLANES, LANES),
                                       jnp.float32),
        grid_spec=pltpu.PrefetchScalarGridSpec(
            num_scalar_prefetch=1,
            grid=(num_tiles,),
            in_specs=[
                pl.BlockSpec((TILE_ROWS, LANES), lambda i, fid: (i, 0)),
                pl.BlockSpec((TILE_ROWS, LANES), lambda i, fid: (i, 0)),
            ],
            # Route each tile's accumulation to its feature's output block.
            out_specs=pl.BlockSpec((1, SUBLANES, LANES),
                                   lambda i, fid: (fid[i], 0, 0)),
        ),
        compiler_params=pltpu.CompilerParams(
            dimension_semantics=("arbitrary",)),
    )(fids, out_slab, tgt_slab)
    # Single final cross-lane/sublane collapse, outside the hot loop.
    return jnp.sum(acc, axis=(1, 2))


def _pad_to(flat, padded_elems):
    n = flat.shape[0]
    if padded_elems != n:
        flat = jnp.pad(flat, (0, padded_elems - n))
    return flat


@jax.jit
def _feature_loss_impl(target_features, output_features, feature_weight):
    num_features = len(target_features)
    common_dtype = jnp.result_type(
        *[f.dtype for f in tuple(target_features) + tuple(output_features)])

    out_pieces, tgt_pieces = [], []
    fid_list, inv_numels = [], []
    for fid, (tgt, out) in enumerate(zip(target_features, output_features)):
        numel = int(np.prod(tgt.shape))
        n_tiles = -(-numel // TILE_ELEMS)          # ceil div
        padded = n_tiles * TILE_ELEMS
        # Keep the original (possibly bf16) dtype in the slab; cast in-kernel.
        out_pieces.append(_pad_to(jnp.ravel(out).astype(common_dtype), padded))
        tgt_pieces.append(_pad_to(jnp.ravel(tgt).astype(common_dtype), padded))
        fid_list.extend([fid] * n_tiles)
        inv_numels.append(1.0 / numel)

    out_slab = jnp.concatenate(out_pieces).reshape(-1, LANES)
    tgt_slab = jnp.concatenate(tgt_pieces).reshape(-1, LANES)
    fids = jnp.asarray(fid_list, dtype=jnp.int32)
    inv_numels = jnp.asarray(inv_numels, dtype=jnp.float32)

    per_feature_ssd = _fused_feature_ssd(fids, out_slab, tgt_slab, num_features)
    feature_loss = jnp.mean(per_feature_ssd * inv_numels) * jnp.float32(0.5)
    weighted_feature_loss = feature_loss * feature_weight.astype(jnp.float32)
    return feature_loss, weighted_feature_loss


class FeatureLoss:
    """JAX/Pallas port of the PyTorch FeatureLoss module."""

    def __init__(self, batch_size: int, feature_weight: float):
        # batch_size kept for interface parity; the two-step mean in the
        # reference equals the global mean (equal-size batch rows).
        self.config_batch_size = int(batch_size)
        self.config_feature_weight = float(feature_weight)

    def __call__(self, target_features, output_features):
        return _feature_loss_impl(
            tuple(target_features),
            tuple(output_features),
            jnp.float32(self.config_feature_weight),
        )


if __name__ == "__main__":
    key = jax.random.PRNGKey(0)

    batch = 2
    feature_weight = 10.0

    # Synthetic multi-scale feature maps (NCHW), as a VGG-style extractor emits.
    feat_shapes = [(batch, 4, 16, 16), (batch, 8, 8, 8), (batch, 16, 4, 4)]

    keys = jax.random.split(key, 2 * len(feat_shapes))
    target_features = tuple(
        jax.random.normal(keys[2 * i], shp, dtype=jnp.float32)
        for i, shp in enumerate(feat_shapes)
    )
    output_features = tuple(
        jax.random.normal(keys[2 * i + 1], shp, dtype=jnp.float32)
        for i, shp in enumerate(feat_shapes)
    )

    loss_mod = FeatureLoss(batch_size=batch, feature_weight=feature_weight)
    feature_loss, weighted_feature_loss = loss_mod(target_features, output_features)
    jax.block_until_ready((feature_loss, weighted_feature_loss))

    # Pure-JAX reference (same semantics as the PyTorch forward).
    ref_terms = [
        jnp.mean(jnp.mean(jnp.square(o - t).reshape(batch, -1), axis=1))
        for t, o in zip(target_features, output_features)
    ]
    ref_loss = jnp.mean(jnp.stack(ref_terms)) * 0.5
    assert jnp.allclose(feature_loss, ref_loss, rtol=1e-5, atol=1e-6)
    assert jnp.allclose(weighted_feature_loss, ref_loss * feature_weight,
                        rtol=1e-5, atol=1e-6)

    print("KERNEL_OK")
</pallas_src>

<mosaic_0001>
module attributes {stable_mosaic.version = 11 : i64} {
  func.func @_fused_sqdiff_kernel(%arg0: i32, %arg1: memref<3xi32, #tpu.memory_space<smem>>, %arg2: memref<512x128xf32, #tpu.memory_space<vmem>>, %arg3: memref<512x128xf32, #tpu.memory_space<vmem>>, %arg4: memref<1x8x128xf32, #tpu.memory_space<vmem>>) attributes {dimension_semantics = [#tpu.dimension_semantics<arbitrary>], iteration_bounds = array<i64: 3>, scalar_prefetch = 1 : i64, scratch_operands = 0 : i64, tpu.core_type = #tpu.core_type<tc>, window_params = [{transform_indices = @transform_0, window_bounds = array<i64: 512, 128>}, {transform_indices = @transform_1, window_bounds = array<i64: 512, 128>}, {transform_indices = @transform_2, window_bounds = array<i64: 1, 8, 128>}]} {
    %0 = arith.index_cast %arg0 : i32 to index
    %1 = memref.load %arg1[%0] : memref<3xi32, #tpu.memory_space<smem>>
    %c1_i32 = arith.constant 1 : i32
    %2 = arith.subi %arg0, %c1_i32 : i32
    %c0_i32 = arith.constant 0 : i32
    %3 = arith.maxsi %2, %c0_i32 : i32
    %4 = arith.index_cast %3 : i32 to index
    %5 = memref.load %arg1[%4] : memref<3xi32, #tpu.memory_space<smem>>
    %c0_i32_0 = arith.constant 0 : i32
    %6 = arith.cmpi eq, %arg0, %c0_i32_0 : i32
    %7 = arith.cmpi ne, %1, %5 : i32
    %8 = arith.ori %6, %7 : i1
    %9 = arith.extui %8 : i1 to i32
    %c0_i32_1 = arith.constant 0 : i32
    %10 = arith.cmpi ne, %9, %c0_i32_1 : i32
    scf.if %10 {
      %cst_11 = arith.constant 0.000000e+00 : f32
      %21 = vector.broadcast %cst_11 : f32 to vector<1x8x128xf32>
      %c0_12 = arith.constant 0 : index
      %c0_13 = arith.constant 0 : index
      %c0_14 = arith.constant 0 : index
      %22 = vector.load %arg4[%c0_12, %c0_13, %c0_14] : memref<1x8x128xf32, #tpu.memory_space<vmem>>, vector<1x8x128xf32>
      tpu.vector_store %arg4[%c0_12, %c0_13, %c0_14], %21 {strides = array<i32>} : memref<1x8x128xf32, #tpu.memory_space<vmem>>, vector<1x8x128xf32>,
    } else {
    }
    %c0 = arith.constant 0 : index
    %c0_2 = arith.constant 0 : index
    %11 = vector.load %arg2[%c0, %c0_2] : memref<512x128xf32, #tpu.memory_space<vmem>>, vector<512x128xf32>
    %c0_3 = arith.constant 0 : index
    %c0_4 = arith.constant 0 : index
    %12 = vector.load %arg3[%c0_3, %c0_4] : memref<512x128xf32, #tpu.memory_space<vmem>>, vector<512x128xf32>
    %13 = arith.subf %11, %12 : vector<512x128xf32>
    %14 = arith.mulf %13, %13 : vector<512x128xf32>
    %15 = vector.shape_cast %14 : vector<512x128xf32> to vector<64x8x128xf32>
    %cst = arith.constant dense<0.000000e+00> : vector<8x128xf32>
    %16 = vector.multi_reduction <add>, %15, %cst [0] : vector<64x8x128xf32> to vector<8x128xf32>
    %c0_5 = arith.constant 0 : index
    %c0_6 = arith.constant 0 : index
    %c0_7 = arith.constant 0 : index
    %17 = vector.load %arg4[%c0_5, %c0_6, %c0_7] : memref<1x8x128xf32, #tpu.memory_space<vmem>>, vector<1x8x128xf32>
    %18 = vector.shape_cast %16 : vector<8x128xf32> to vector<1x8x128xf32>
    %19 = arith.addf %17, %18 : vector<1x8x128xf32>
    %c0_8 = arith.constant 0 : index
    %c0_9 = arith.constant 0 : index
    %c0_10 = arith.constant 0 : index
    %20 = vector.load %arg4[%c0_8, %c0_9, %c0_10] : memref<1x8x128xf32, #tpu.memory_space<vmem>>, vector<1x8x128xf32>
    tpu.vector_store %arg4[%c0_8, %c0_9, %c0_10], %19 {strides = array<i32>} : memref<1x8x128xf32, #tpu.memory_space<vmem>>, vector<1x8x128xf32>,
    return
  }
  func.func @transform_0(%arg0: i32, %arg1: memref<3xi32, #tpu.memory_space<smem>>) -> (i32, i32) {
    %c0_i32 = arith.constant 0 : i32
    %c0_i32_0 = arith.constant 0 : i32
    return %arg0, %c0_i32 : i32, i32
  }
  func.func @transform_1(%arg0: i32, %arg1: memref<3xi32, #tpu.memory_space<smem>>) -> (i32, i32) {
    %c0_i32 = arith.constant 0 : i32
    %c0_i32_0 = arith.constant 0 : i32
    return %arg0, %c0_i32 : i32, i32
  }
  func.func @transform_2(%arg0: i32, %arg1: memref<3xi32, #tpu.memory_space<smem>>) -> (i32, i32, i32) {
    %0 = arith.index_cast %arg0 : i32 to index
    %1 = memref.load %arg1[%0] : memref<3xi32, #tpu.memory_space<smem>>
    %c0_i32 = arith.constant 0 : i32
    %c0_i32_0 = arith.constant 0 : i32
    %c0_i32_1 = arith.constant 0 : i32
    return %1, %c0_i32, %c0_i32_0 : i32, i32, i32
  }
}

</mosaic_0001>

<bundles_post_ra>
// kernel: _feature_loss_impl.1
= control target key start
LH: loop header
LB: loop body
LE: loop exit
PB: predicated region body
PF: predicated region fallthrough
CT: control target
= control target key end

     0   :  { %s807_s0 = inlined_call_operand.vmem [shape: s32[3], index: 0, kind: input, shape index: {}]   ;;  %s808_s1 = inlined_call_operand.vmem [shape: f32[1536,128], index: 1, kind: input, shape index: {}]   ;;  %s809_s2 = inlined_call_operand.vmem [shape: f32[1536,128], index: 2, kind: input, shape index: {}]   ;;  %s810_s3 = inlined_call_operand.vmem [shape: f32[3,8,128], index: 3, kind: output, shape index: {}]  }
   0x1   :  { %s8_s14 = sshll.u32 %s807_s0, 4  ;;  %s9_s14 = int_to_ptr.vmem [resolvable:$true] %s8_s14 }
   0x2   :  { %s603_s15 = scalar_lea.vmem %s9_s14, 16  ;;  %p608_p1 = scmp.lt.s32.totalorder %s9_s14, %s9_s14 }
   0x3   :  { %p604_p0 = scmp.ne.s32.totalorder %s9_s14, %s603_s15  ;;  %p609_p2 = scmp.lt.s32.totalorder %s603_s15, %s603_s15 }
   0x5   :  { %p610_p3 = por %p609_p2, %p608_p1 }
   0x7   :  { %p611_p4 = pnand %p610_p3, %p604_p0 }
   0x9   :  { %614 = shalt.err (!%p611_p4)  }
   0xa   :  { %s625_s16 = smov [#allocation3]  }
   0xb   :  { %11 = dma.vmem_to_smem %s9_s14, 16, %s625_s16, [#allocation2] }
   0xc   :  { %619 = dma.done.wait [#allocation2], 16 }
   0xd   :  { %620 = vsyncadd [#allocation2], 4294967280 }
   0xe   :  { %13 = sfence }
   0xf   :  { %s650_s17 = smov 0  }
  0x10 LB: > { %s580_s0 = sadd.s32 4294967295, %s623_s17   ;;  %p584_p5 = scmp.ge.s32.totalorder %s623_s17, 1  ;;  %s623_s17 = sphi %s650_s17, %s19_s17  }
  0x11   : > { %p133_p6 = scmp.lt.s32.totalorder %s623_s17, 4 }
  0x13   : > { %p134_p7 = pnand %p584_p5, %p133_p6 }
  0x14   : > { %s585_s18 = sshll.u32 (!%p134_p7), %s580_s0, 6  ;;  %s172_s19 = sld [smem:[#allocation3 + %s580_s0]] (!%p134_p7) }
  0x15   : > { %137 = sbr.rel (%p134_p7) target bundleno = 179 (0xb3), region = 28  ;;  %p161_p8 = scmp.lt.s32.totalorder (!%p134_p7), %s585_s18, 191 }
  0x16   : > { %s590_s20 = sadd.s32 (!%p134_p7), 4294967295, %s580_s0  ;;  %s178_s28 = sld [smem:[#allocation3 + %s580_s0]] (!%p134_p7) }
  0x17   : > { %p180_p9 = scmp.gt.s32.totalorder (!%p134_p7), %s590_s20, 0  ;;  %p183_p11 = scmp.eq.s32.totalorder (!%p134_p7), %s580_s0, 0 }
  0x1a   : > { %s812_s18 = smov (!%p161_p8, %s585_s18), 191  ;;  %p173_p10 = scmp.lt.s32.totalorder %s172_s19, 2 }
  0x1b   : > { %s586_s21 = sshll.u32 %s812_s18, 3  ;;  %s814_s20 = smov (!%p180_p9, %s590_s20), 0 }
  0x1c   : > { %s661_s24 = scalar_lea.vmem %s808_s1, %s586_s21  ;;  %s666_s27 = scalar_lea.vmem %s809_s2, %s586_s21 }
  0x1d   : > { %s816_s19 = smov (!%p173_p10, %s172_s19), 2  ;;  %s182_s29 = sld [smem:[#allocation3 + %s814_s20]] }
  0x1e   : > { %s589_s30 = sshll.u32 %s816_s19, 3 }
  0x1f   : > { %s671_s6 = scalar_lea.vmem %s810_s3, %s589_s30 }
  0x23   : > { %p184_p12 = scmp.ne.s32.totalorder %s178_s28, %s182_s29 }
  0x25   : > { %p185_p13 = por %p184_p12, %p183_p11 }
  0x26   : > { %v626_v0 = vmov (%p185_p13), 0.0  }
  0x27   : > { %188 = sbr.rel (!%p185_p13) target bundleno = 44 (0x2c), region = 32  ;;  %189 = vst [vmem:[%s671_s6] sm:$0xff] (%p185_p13), %v626_v0 }
  0x2c PF: > { %v190_v1 = vld [vmem:[%s661_s24] sm:$0xff]  ;;  %v191_v2 = vld [vmem:[%s661_s24 + $0x8] sm:$0xff]  ;;  %v192_v5 = vld [vmem:[%s661_s24 + $0x10] sm:$0xff] }
  0x2d   : > { %v254_v3 = vld [vmem:[%s666_s27] sm:$0xff]  ;;  %v255_v4 = vld [vmem:[%s666_s27 + $0x8] sm:$0xff]  ;;  %v256_v6 = vld [vmem:[%s666_s27 + $0x10] sm:$0xff] }
  0x2e   : > { %v318_v7 = vsub.f32 %v190_v1, %v254_v3  ;;  %v319_v8 = vsub.f32 %v191_v2, %v255_v4  ;;  %v193_v9 = vld [vmem:[%s661_s24 + $0x18] sm:$0xff]  ;;  %v320_v11 = vsub.f32 %v192_v5, %v256_v6  ;;  %v194_v12 = vld [vmem:[%s661_s24 + $0x20] sm:$0xff]  ;;  %v195_v17 = vld [vmem:[%s661_s24 + $0x28] sm:$0xff] }
  0x2f   : > { %v257_v10 = vld [vmem:[%s666_s27 + $0x18] sm:$0xff]  ;;  %v258_v13 = vld [vmem:[%s666_s27 + $0x20] sm:$0xff]  ;;  %v259_v18 = vld [vmem:[%s666_s27 + $0x28] sm:$0xff] }
  0x30   : > { %v321_v14 = vsub.f32 %v193_v9, %v257_v10  ;;  %v382_v15 = vmul.f32 %v318_v7, %v318_v7  ;;  %v383_v16 = vmul.f32 %v319_v8, %v319_v8  ;;  %v322_v19 = vsub.f32 %v194_v12, %v258_v13  ;;  %v196_v21 = vld [vmem:[%s661_s24 + $0x30] sm:$0xff]  ;;  %v197_v26 = vld [vmem:[%s661_s24 + $0x38] sm:$0xff]  ;;  %v198_v31 = vld [vmem:[%s661_s24 + $0x40] sm:$0xff] }
  0x31   : > { %v384_v20 = vmul.f32 %v320_v11, %v320_v11  ;;  %v260_v22 = vld [vmem:[%s666_s27 + $0x30] sm:$0xff]  ;;  %v323_v23 = vsub.f32 %v195_v17, %v259_v18  ;;  %v261_v27 = vld [vmem:[%s666_s27 + $0x38] sm:$0xff]  ;;  %v262_v32 = vld [vmem:[%s666_s27 + $0x40] sm:$0xff] }
  0x32   : > { %v385_v24 = vmul.f32 %v321_v14, %v321_v14  ;;  %v446_v25 = vadd.f32 %v383_v16, %v382_v15  ;;  %v324_v28 = vsub.f32 %v196_v21, %v260_v22  ;;  %v386_v29 = vmul.f32 %v322_v19, %v322_v19  ;;  %v199_v36 = vld [vmem:[%s661_s24 + $0x48] sm:$0xff]  ;;  %v200_v41 = vld [vmem:[%s661_s24 + $0x50] sm:$0xff]  ;;  %v201_v46 = vld [vmem:[%s661_s24 + $0x58] sm:$0xff] }
  0x33   : > { %v325_v33 = vsub.f32 %v197_v26, %v261_v27  ;;  %v387_v34 = vmul.f32 %v323_v23, %v323_v23  ;;  %v263_v37 = vld [vmem:[%s666_s27 + $0x48] sm:$0xff]  ;;  %v326_v38 = vsub.f32 %v198_v31, %v262_v32  ;;  %v264_v42 = vld [vmem:[%s666_s27 + $0x50] sm:$0xff]  ;;  %v265_v47 = vld [vmem:[%s666_s27 + $0x58] sm:$0xff] }
  0x34   : > { %v447_v30 = vadd.f32 %v446_v25, %v384_v20  ;;  %v388_v39 = vmul.f32 %v324_v28, %v324_v28  ;;  %v327_v43 = vsub.f32 %v199_v36, %v263_v37  ;;  %v328_v48 = vsub.f32 %v200_v41, %v264_v42  ;;  %v202_v51 = vld [vmem:[%s661_s24 + $0x60] sm:$0xff]  ;;  %v203_v56 = vld [vmem:[%s661_s24 + $0x68] sm:$0xff]  ;;  %v204_v61 = vld [vmem:[%s661_s24 + $0x70] sm:$0xff] }
  0x35   : > { %v389_v44 = vmul.f32 %v325_v33, %v325_v33  ;;  %v390_v49 = vmul.f32 %v326_v38, %v326_v38  ;;  %v266_v52 = vld [vmem:[%s666_s27 + $0x60] sm:$0xff]  ;;  %v329_v53 = vsub.f32 %v201_v46, %v265_v47  ;;  %v267_v57 = vld [vmem:[%s666_s27 + $0x68] sm:$0xff]  ;;  %v268_v62 = vld [vmem:[%s666_s27 + $0x70] sm:$0xff] }
  0x36   : > { %v448_v35 = vadd.f32 %v447_v30, %v385_v24  ;;  %v391_v54 = vmul.f32 %v327_v43, %v327_v43  ;;  %v330_v58 = vsub.f32 %v202_v51, %v266_v52  ;;  %v392_v59 = vmul.f32 %v328_v48, %v328_v48  ;;  %v205_v2 = vld [vmem:[%s661_s24 + $0x78] sm:$0xff]  ;;  %v206_v7 = vld [vmem:[%s661_s24 + $0x80] sm:$0xff]  ;;  %v207_v12 = vld [vmem:[%s661_s24 + $0x88] sm:$0xff] }
  0x37   : > { %v331_v63 = vsub.f32 %v203_v56, %v267_v57  ;;  %v393_v0 = vmul.f32 %v329_v53, %v329_v53  ;;  %v269_v3 = vld [vmem:[%s666_s27 + $0x78] sm:$0xff]  ;;  %v332_v4 = vsub.f32 %v204_v61, %v268_v62  ;;  %v270_v8 = vld [vmem:[%s666_s27 + $0x80] sm:$0xff]  ;;  %v271_v13 = vld [vmem:[%s666_s27 + $0x88] sm:$0xff] }
  0x38   : > { %v449_v40 = vadd.f32 %v448_v35, %v386_v29  ;;  %v394_v5 = vmul.f32 %v330_v58, %v330_v58  ;;  %v333_v9 = vsub.f32 %v205_v2, %v269_v3  ;;  %v334_v14 = vsub.f32 %v206_v7, %v270_v8  ;;  %v208_v17 = vld [vmem:[%s661_s24 + $0x90] sm:$0xff]  ;;  %v209_v22 = vld [vmem:[%s661_s24 + $0x98] sm:$0xff]  ;;  %v210_v27 = vld [vmem:[%s661_s24 + $0xa0] sm:$0xff] }
  0x39   : > { %v395_v10 = vmul.f32 %v331_v63, %v331_v63  ;;  %v396_v15 = vmul.f32 %v332_v4, %v332_v4  ;;  %v272_v18 = vld [vmem:[%s666_s27 + $0x90] sm:$0xff]  ;;  %v335_v19 = vsub.f32 %v207_v12, %v271_v13  ;;  %v273_v23 = vld [vmem:[%s666_s27 + $0x98] sm:$0xff]  ;;  %v274_v28 = vld [vmem:[%s666_s27 + $0xa0] sm:$0xff] }
  0x3a   : > { %v450_v45 = vadd.f32 %v449_v40, %v387_v34  ;;  %v397_v20 = vmul.f32 %v333_v9, %v333_v9  ;;  %v336_v24 = vsub.f32 %v208_v17, %v272_v18  ;;  %v398_v25 = vmul.f32 %v334_v14, %v334_v14  ;;  %v211_v32 = vld [vmem:[%s661_s24 + $0xa8] sm:$0xff]  ;;  %v212_v37 = vld [vmem:[%s661_s24 + $0xb0] sm:$0xff]  ;;  %v213_v42 = vld [vmem:[%s661_s24 + $0xb8] sm:$0xff] }
  0x3b   : > { %v337_v29 = vsub.f32 %v209_v22, %v273_v23  ;;  %v399_v30 = vmul.f32 %v335_v19, %v335_v19  ;;  %v275_v33 = vld [vmem:[%s666_s27 + $0xa8] sm:$0xff]  ;;  %v338_v34 = vsub.f32 %v210_v27, %v274_v28  ;;  %v276_v38 = vld [vmem:[%s666_s27 + $0xb0] sm:$0xff]  ;;  %v277_v43 = vld [vmem:[%s666_s27 + $0xb8] sm:$0xff] }
  0x3c   : > { %v451_v50 = vadd.f32 %v450_v45, %v388_v39  ;;  %v400_v35 = vmul.f32 %v336_v24, %v336_v24  ;;  %v339_v39 = vsub.f32 %v211_v32, %v275_v33  ;;  %v214_v47 = vld [vmem:[%s661_s24 + $0xc0] sm:$0xff]  ;;  %v215_v52 = vld [vmem:[%s661_s24 + $0xc8] sm:$0xff]  ;;  %v216_v57 = vld [vmem:[%s661_s24 + $0xd0] sm:$0xff] }
  0x3d   : > { %v401_v40 = vmul.f32 %v337_v29, %v337_v29  ;;  %v402_v45 = vmul.f32 %v338_v34, %v338_v34  ;;  %v278_v48 = vld [vmem:[%s666_s27 + $0xc0] sm:$0xff]  ;;  %v279_v53 = vld [vmem:[%s666_s27 + $0xc8] sm:$0xff]  ;;  %v280_v58 = vld [vmem:[%s666_s27 + $0xd0] sm:$0xff] }
  0x3e   : > { %v452_v55 = vadd.f32 %v451_v50, %v389_v44  ;;  %v340_v44 = vsub.f32 %v212_v37, %v276_v38  ;;  %v403_v50 = vmul.f32 %v339_v39, %v339_v39  ;;  %v217_v62 = vld [vmem:[%s661_s24 + $0xd8] sm:$0xff]  ;;  %v218_v3 = vld [vmem:[%s661_s24 + $0xe0] sm:$0xff]  ;;  %v219_v8 = vld [vmem:[%s661_s24 + $0xe8] sm:$0xff] }
  0x3f   : > { %v281_v63 = vld [vmem:[%s666_s27 + $0xd8] sm:$0xff]  ;;  %v282_v4 = vld [vmem:[%s666_s27 + $0xe0] sm:$0xff]  ;;  %v283_v9 = vld [vmem:[%s666_s27 + $0xe8] sm:$0xff] }
  0x40   : > { %v453_v60 = vadd.f32 %v452_v55, %v390_v49  ;;  %v341_v49 = vsub.f32 %v213_v42, %v277_v43  ;;  %v404_v55 = vmul.f32 %v340_v44, %v340_v44  ;;  %v220_v13 = vld [vmem:[%s661_s24 + $0xf0] sm:$0xff]  ;;  %v221_v18 = vld [vmem:[%s661_s24 + $0xf8] sm:$0xff]  ;;  %v222_v23 = vld [vmem:[%s661_s24 + $0x100] sm:$0xff] }
  0x41   : > { %v284_v14 = vld [vmem:[%s666_s27 + $0xf0] sm:$0xff]  ;;  %v285_v19 = vld [vmem:[%s666_s27 + $0xf8] sm:$0xff]  ;;  %v286_v24 = vld [vmem:[%s666_s27 + $0x100] sm:$0xff] }
  0x42   : > { %v454_v1 = vadd.f32 %v453_v60, %v391_v54  ;;  %v342_v54 = vsub.f32 %v214_v47, %v278_v48  ;;  %v405_v60 = vmul.f32 %v341_v49, %v341_v49  ;;  %v223_v28 = vld [vmem:[%s661_s24 + $0x108] sm:$0xff]  ;;  %v224_v33 = vld [vmem:[%s661_s24 + $0x110] sm:$0xff]  ;;  %v225_v38 = vld [vmem:[%s661_s24 + $0x118] sm:$0xff] }
  0x43   : > { %v287_v29 = vld [vmem:[%s666_s27 + $0x108] sm:$0xff]  ;;  %v288_v34 = vld [vmem:[%s666_s27 + $0x110] sm:$0xff]  ;;  %v289_v39 = vld [vmem:[%s666_s27 + $0x118] sm:$0xff] }
  0x44   : > { %v455_v6 = vadd.f32 %v454_v1, %v392_v59  ;;  %v343_v59 = vsub.f32 %v215_v52, %v279_v53  ;;  %v406_v1 = vmul.f32 %v342_v54, %v342_v54  ;;  %v226_v43 = vld [vmem:[%s661_s24 + $0x120] sm:$0xff]  ;;  %v227_v48 = vld [vmem:[%s661_s24 + $0x128] sm:$0xff]  ;;  %v228_v53 = vld [vmem:[%s661_s24 + $0x130] sm:$0xff] }
  0x45   : > { %v290_v44 = vld [vmem:[%s666_s27 + $0x120] sm:$0xff]  ;;  %v291_v49 = vld [vmem:[%s666_s27 + $0x128] sm:$0xff]  ;;  %v292_v54 = vld [vmem:[%s666_s27 + $0x130] sm:$0xff] }
  0x46   : > { %v456_v11 = vadd.f32 %v455_v6, %v393_v0  ;;  %v344_v0 = vsub.f32 %v216_v57, %v280_v58  ;;  %v407_v6 = vmul.f32 %v343_v59, %v343_v59  ;;  %v229_v58 = vld [vmem:[%s661_s24 + $0x138] sm:$0xff] }
  0x47   : > { %v293_v59 = vld [vmem:[%s666_s27 + $0x138] sm:$0xff] }
  0x48   : > { %v457_v16 = vadd.f32 %v456_v11, %v394_v5  ;;  %v345_v5 = vsub.f32 %v217_v62, %v281_v63  ;;  %v408_v11 = vmul.f32 %v344_v0, %v344_v0  ;;  %v230_v63 = vld [vmem:[%s661_s24 + $0x140] sm:$0xff] }
  0x49   : > { %v294_v0 = vld [vmem:[%s666_s27 + $0x140] sm:$0xff] }
  0x4a   : > { %v458_v21 = vadd.f32 %v457_v16, %v395_v10  ;;  %v346_v10 = vsub.f32 %v218_v3, %v282_v4  ;;  %v409_v16 = vmul.f32 %v345_v5, %v345_v5  ;;  %v231_v4 = vld [vmem:[%s661_s24 + $0x148] sm:$0xff] }
  0x4b   : > { %v295_v5 = vld [vmem:[%s666_s27 + $0x148] sm:$0xff] }
  0x4c   : > { %v459_v26 = vadd.f32 %v458_v21, %v396_v15  ;;  %v347_v15 = vsub.f32 %v219_v8, %v283_v9  ;;  %v410_v21 = vmul.f32 %v346_v10, %v346_v10  ;;  %v232_v9 = vld [vmem:[%s661_s24 + $0x150] sm:$0xff] }
  0x4d   : > { %v296_v10 = vld [vmem:[%s666_s27 + $0x150] sm:$0xff] }
  0x4e   : > { %v460_v31 = vadd.f32 %v459_v26, %v397_v20  ;;  %v348_v20 = vsub.f32 %v220_v13, %v284_v14  ;;  %v411_v26 = vmul.f32 %v347_v15, %v347_v15  ;;  %v233_v14 = vld [vmem:[%s661_s24 + $0x158] sm:$0xff] }
  0x4f   : > { %v297_v15 = vld [vmem:[%s666_s27 + $0x158] sm:$0xff] }
  0x50   : > { %v461_v36 = vadd.f32 %v460_v31, %v398_v25  ;;  %v349_v25 = vsub.f32 %v221_v18, %v285_v19  ;;  %v412_v31 = vmul.f32 %v348_v20, %v348_v20  ;;  %v234_v19 = vld [vmem:[%s661_s24 + $0x160] sm:$0xff] }
  0x51   : > { %v298_v20 = vld [vmem:[%s666_s27 + $0x160] sm:$0xff] }
  0x52   : > { %v462_v41 = vadd.f32 %v461_v36, %v399_v30  ;;  %v350_v30 = vsub.f32 %v222_v23, %v286_v24  ;;  %v413_v36 = vmul.f32 %v349_v25, %v349_v25  ;;  %v235_v24 = vld [vmem:[%s661_s24 + $0x168] sm:$0xff] }
  0x53   : > { %v299_v25 = vld [vmem:[%s666_s27 + $0x168] sm:$0xff] }
  0x54   : > { %v463_v46 = vadd.f32 %v462_v41, %v400_v35  ;;  %v351_v35 = vsub.f32 %v223_v28, %v287_v29  ;;  %v414_v41 = vmul.f32 %v350_v30, %v350_v30  ;;  %v236_v29 = vld [vmem:[%s661_s24 + $0x170] sm:$0xff] }
  0x55   : > { %v300_v30 = vld [vmem:[%s666_s27 + $0x170] sm:$0xff] }
  0x56   : > { %v464_v51 = vadd.f32 %v463_v46, %v401_v40  ;;  %v352_v40 = vsub.f32 %v224_v33, %v288_v34  ;;  %v415_v46 = vmul.f32 %v351_v35, %v351_v35  ;;  %v237_v34 = vld [vmem:[%s661_s24 + $0x178] sm:$0xff] }
  0x57   : > { %v301_v35 = vld [vmem:[%s666_s27 + $0x178] sm:$0xff] }
  0x58   : > { %v465_v56 = vadd.f32 %v464_v51, %v402_v45  ;;  %v353_v45 = vsub.f32 %v225_v38, %v289_v39  ;;  %v416_v51 = vmul.f32 %v352_v40, %v352_v40  ;;  %v238_v39 = vld [vmem:[%s661_s24 + $0x180] sm:$0xff] }
  0x59   : > { %v302_v40 = vld [vmem:[%s666_s27 + $0x180] sm:$0xff] }
  0x5a   : > { %v466_v61 = vadd.f32 %v465_v56, %v403_v50  ;;  %v354_v50 = vsub.f32 %v226_v43, %v290_v44  ;;  %v417_v56 = vmul.f32 %v353_v45, %v353_v45  ;;  %v239_v44 = vld [vmem:[%s661_s24 + $0x188] sm:$0xff] }
  0x5b   : > { %v303_v45 = vld [vmem:[%s666_s27 + $0x188] sm:$0xff] }
  0x5c   : > { %v467_v2 = vadd.f32 %v466_v61, %v404_v55  ;;  %v355_v55 = vsub.f32 %v227_v48, %v291_v49  ;;  %v418_v61 = vmul.f32 %v354_v50, %v354_v50  ;;  %v240_v49 = vld [vmem:[%s661_s24 + $0x190] sm:$0xff] }
  0x5d   : > { %v304_v50 = vld [vmem:[%s666_s27 + $0x190] sm:$0xff] }
  0x5e   : > { %v468_v7 = vadd.f32 %v467_v2, %v405_v60  ;;  %v356_v60 = vsub.f32 %v228_v53, %v292_v54  ;;  %v419_v2 = vmul.f32 %v355_v55, %v355_v55  ;;  %v241_v54 = vld [vmem:[%s661_s24 + $0x198] sm:$0xff] }
  0x5f   : > { %v305_v55 = vld [vmem:[%s666_s27 + $0x198] sm:$0xff] }
  0x60   : > { %v469_v12 = vadd.f32 %v468_v7, %v406_v1  ;;  %v357_v1 = vsub.f32 %v229_v58, %v293_v59  ;;  %v420_v7 = vmul.f32 %v356_v60, %v356_v60  ;;  %v242_v59 = vld [vmem:[%s661_s24 + $0x1a0] sm:$0xff] }
  0x61   : > { %v306_v60 = vld [vmem:[%s666_s27 + $0x1a0] sm:$0xff] }
  0x62   : > { %v470_v17 = vadd.f32 %v469_v12, %v407_v6  ;;  %v358_v6 = vsub.f32 %v230_v63, %v294_v0  ;;  %v421_v12 = vmul.f32 %v357_v1, %v357_v1  ;;  %v243_v0 = vld [vmem:[%s661_s24 + $0x1a8] sm:$0xff] }
  0x63   : > { %v307_v1 = vld [vmem:[%s666_s27 + $0x1a8] sm:$0xff] }
  0x64   : > { %v471_v22 = vadd.f32 %v470_v17, %v408_v11  ;;  %v359_v11 = vsub.f32 %v231_v4, %v295_v5  ;;  %v422_v17 = vmul.f32 %v358_v6, %v358_v6  ;;  %v244_v5 = vld [vmem:[%s661_s24 + $0x1b0] sm:$0xff] }
  0x65   : > { %v308_v6 = vld [vmem:[%s666_s27 + $0x1b0] sm:$0xff] }
  0x66   : > { %v472_v27 = vadd.f32 %v471_v22, %v409_v16  ;;  %v360_v16 = vsub.f32 %v232_v9, %v296_v10  ;;  %v423_v22 = vmul.f32 %v359_v11, %v359_v11  ;;  %v245_v10 = vld [vmem:[%s661_s24 + $0x1b8] sm:$0xff] }
  0x67   : > { %v309_v11 = vld [vmem:[%s666_s27 + $0x1b8] sm:$0xff] }
  0x68   : > { %v473_v32 = vadd.f32 %v472_v27, %v410_v21  ;;  %v361_v21 = vsub.f32 %v233_v14, %v297_v15  ;;  %v424_v27 = vmul.f32 %v360_v16, %v360_v16  ;;  %v246_v15 = vld [vmem:[%s661_s24 + $0x1c0] sm:$0xff] }
  0x69   : > { %v310_v16 = vld [vmem:[%s666_s27 + $0x1c0] sm:$0xff] }
  0x6a   : > { %v474_v37 = vadd.f32 %v473_v32, %v411_v26  ;;  %v362_v26 = vsub.f32 %v234_v19, %v298_v20  ;;  %v425_v32 = vmul.f32 %v361_v21, %v361_v21  ;;  %v247_v20 = vld [vmem:[%s661_s24 + $0x1c8] sm:$0xff] }
  0x6b   : > { %v311_v21 = vld [vmem:[%s666_s27 + $0x1c8] sm:$0xff] }
  0x6c   : > { %v475_v42 = vadd.f32 %v474_v37, %v412_v31  ;;  %v363_v31 = vsub.f32 %v235_v24, %v299_v25  ;;  %v426_v37 = vmul.f32 %v362_v26, %v362_v26  ;;  %v248_v25 = vld [vmem:[%s661_s24 + $0x1d0] sm:$0xff] }
  0x6d   : > { %v312_v26 = vld [vmem:[%s666_s27 + $0x1d0] sm:$0xff] }
  0x6e   : > { %v476_v47 = vadd.f32 %v475_v42, %v413_v36  ;;  %v364_v36 = vsub.f32 %v236_v29, %v300_v30  ;;  %v427_v42 = vmul.f32 %v363_v31, %v363_v31  ;;  %v249_v30 = vld [vmem:[%s661_s24 + $0x1d8] sm:$0xff] }
  0x6f   : > { %v313_v31 = vld [vmem:[%s666_s27 + $0x1d8] sm:$0xff] }
  0x70   : > { %v477_v52 = vadd.f32 %v476_v47, %v414_v41  ;;  %v365_v41 = vsub.f32 %v237_v34, %v301_v35  ;;  %v428_v47 = vmul.f32 %v364_v36, %v364_v36  ;;  %v250_v35 = vld [vmem:[%s661_s24 + $0x1e0] sm:$0xff] }
  0x71   : > { %v314_v36 = vld [vmem:[%s666_s27 + $0x1e0] sm:$0xff] }
  0x72   : > { %v478_v57 = vadd.f32 %v477_v52, %v415_v46  ;;  %v366_v46 = vsub.f32 %v238_v39, %v302_v40  ;;  %v429_v52 = vmul.f32 %v365_v41, %v365_v41  ;;  %v251_v40 = vld [vmem:[%s661_s24 + $0x1e8] sm:$0xff] }
  0x73   : > { %v315_v41 = vld [vmem:[%s666_s27 + $0x1e8] sm:$0xff] }
  0x74   : > { %v479_v62 = vadd.f32 %v478_v57, %v416_v51  ;;  %v367_v51 = vsub.f32 %v239_v44, %v303_v45  ;;  %v430_v57 = vmul.f32 %v366_v46, %v366_v46  ;;  %v252_v45 = vld [vmem:[%s661_s24 + $0x1f0] sm:$0xff] }
  0x75   : > { %v316_v46 = vld [vmem:[%s666_s27 + $0x1f0] sm:$0xff] }
  0x76   : > { %v480_v3 = vadd.f32 %v479_v62, %v417_v56  ;;  %v368_v56 = vsub.f32 %v240_v49, %v304_v50  ;;  %v431_v62 = vmul.f32 %v367_v51, %v367_v51  ;;  %v253_v50 = vld [vmem:[%s661_s24 + $0x1f8] sm:$0xff] }
  0x77   : > { %v317_v51 = vld [vmem:[%s666_s27 + $0x1f8] sm:$0xff] }
  0x78   : > { %v481_v8 = vadd.f32 %v480_v3, %v418_v61  ;;  %v369_v61 = vsub.f32 %v241_v54, %v305_v55  ;;  %v432_v3 = vmul.f32 %v368_v56, %v368_v56  ;;  %v381_v55 = vsub.f32 %v253_v50, %v317_v51 }
  0x7a   : > { %v482_v13 = vadd.f32 %v481_v8, %v419_v2  ;;  %v370_v2 = vsub.f32 %v242_v59, %v306_v60  ;;  %v433_v8 = vmul.f32 %v369_v61, %v369_v61  ;;  %v445_v60 = vmul.f32 %v381_v55, %v381_v55 }
  0x7c   : > { %v483_v18 = vadd.f32 %v482_v13, %v420_v7  ;;  %v371_v7 = vsub.f32 %v243_v0, %v307_v1  ;;  %v434_v13 = vmul.f32 %v370_v2, %v370_v2 }
  0x7e   : > { %v484_v23 = vadd.f32 %v483_v18, %v421_v12  ;;  %v372_v12 = vsub.f32 %v244_v5, %v308_v6  ;;  %v435_v18 = vmul.f32 %v371_v7, %v371_v7 }
  0x80   : > { %v485_v28 = vadd.f32 %v484_v23, %v422_v17  ;;  %v373_v17 = vsub.f32 %v245_v10, %v309_v11  ;;  %v436_v23 = vmul.f32 %v372_v12, %v372_v12 }
  0x82   : > { %v486_v33 = vadd.f32 %v485_v28, %v423_v22  ;;  %v374_v22 = vsub.f32 %v246_v15, %v310_v16  ;;  %v437_v28 = vmul.f32 %v373_v17, %v373_v17 }
  0x84   : > { %v487_v38 = vadd.f32 %v486_v33, %v424_v27  ;;  %v375_v27 = vsub.f32 %v247_v20, %v311_v21  ;;  %v438_v33 = vmul.f32 %v374_v22, %v374_v22 }
  0x86   : > { %v488_v43 = vadd.f32 %v487_v38, %v425_v32  ;;  %v376_v32 = vsub.f32 %v248_v25, %v312_v26  ;;  %v439_v38 = vmul.f32 %v375_v27, %v375_v27 }
  0x88   : > { %v489_v48 = vadd.f32 %v488_v43, %v426_v37  ;;  %v377_v37 = vsub.f32 %v249_v30, %v313_v31  ;;  %v440_v43 = vmul.f32 %v376_v32, %v376_v32 }
  0x8a   : > { %v490_v53 = vadd.f32 %v489_v48, %v427_v42  ;;  %v378_v42 = vsub.f32 %v250_v35, %v314_v36  ;;  %v441_v48 = vmul.f32 %v377_v37, %v377_v37 }
  0x8c   : > { %v491_v58 = vadd.f32 %v490_v53, %v428_v47  ;;  %v379_v47 = vsub.f32 %v251_v40, %v315_v41  ;;  %v442_v53 = vmul.f32 %v378_v42, %v378_v42 }
  0x8e   : > { %v492_v63 = vadd.f32 %v491_v58, %v429_v52  ;;  %v380_v52 = vsub.f32 %v252_v45, %v316_v46  ;;  %v443_v56 = vmul.f32 %v379_v47, %v379_v47 }
  0x90   : > { %v493_v4 = vadd.f32 %v492_v63, %v430_v57  ;;  %v444_v58 = vmul.f32 %v380_v52, %v380_v52  ;;  %v509_v63 = vld [vmem:[%s671_s6] sm:$0xff] }
  0x92   : > { %v494_v9 = vadd.f32 %v493_v4, %v431_v62 }
  0x94   : > { %v495_v14 = vadd.f32 %v494_v9, %v432_v3 }
  0x96   : > { %v496_v19 = vadd.f32 %v495_v14, %v433_v8 }
  0x98   : > { %v497_v24 = vadd.f32 %v496_v19, %v434_v13 }
  0x9a   : > { %v498_v29 = vadd.f32 %v497_v24, %v435_v18 }
  0x9c   : > { %v499_v34 = vadd.f32 %v498_v29, %v436_v23 }
  0x9e   : > { %v500_v39 = vadd.f32 %v499_v34, %v437_v28 }
  0xa0   : > { %v501_v44 = vadd.f32 %v500_v39, %v438_v33 }
  0xa2   : > { %v502_v49 = vadd.f32 %v501_v44, %v439_v38 }
  0xa4   : > { %v503_v54 = vadd.f32 %v502_v49, %v440_v43 }
  0xa6   : > { %v504_v57 = vadd.f32 %v503_v54, %v441_v48 }
  0xa8   : > { %v505_v59 = vadd.f32 %v504_v57, %v442_v53 }
  0xaa   : > { %v506_v61 = vadd.f32 %v505_v59, %v443_v56 }
  0xac   : > { %v507_v62 = vadd.f32 %v506_v61, %v444_v58 }
  0xae   : > { %v508_v0 = vadd.f32 %v507_v62, %v445_v60 }
  0xb0   : > { %v510_v1 = vadd.f32 %v509_v63, %v508_v0 }
  0xb2   : > { %511 = vst [vmem:[%s671_s6] sm:$0xff] %v510_v1 }
  0xb3 PF: > { %s19_s17 = sadd.s32 1, %s623_s17  }
  0xb4   : > { %p16_p0 = scmp.ge.s32.totalorder %s19_s17, 5  }
  0xb6   :  { %18 = sbr.rel (!%p16_p0) target bundleno = 16 (0x10), region = 65 }

</bundles_post_ra>
